<compile_context>
chip_gen: v5e
topology: v5e:2x2
jax: 0.10.0
libtpu: 0.0.40
codegen_flags: <defaults>
</compile_context>

<pallas_src>
import functools

import jax
import jax.numpy as jnp
from jax.experimental import pallas as pl
from jax.experimental.pallas import tpu as pltpu

NEG_SLOPE = 0.01   # PyTorch F.leaky_relu default negative_slope
LANE = 128
SUBLANE = 8


def _round_up(n, m):
    return (n + m - 1) // m * m


def _dropout_bits(shape, row_off_u32, seed_u32):
    """Counter-based uint32 hash (lowbias32-style mixer).

    Depends only on global (row, col) and the seed, so the dropout mask is
    independent of the batch tiling. Pure jnp integer ops -> lowers on TPU
    (VPU) and runs in interpret mode.
    """
    rows = jax.lax.broadcasted_iota(jnp.uint32, shape, 0) + row_off_u32
    cols = jax.lax.broadcasted_iota(jnp.uint32, shape, 1)
    x = (rows * jnp.uint32(0x9E3779B1)
         + cols * jnp.uint32(0x85EBCA77)
         + seed_u32 * jnp.uint32(0xC2B2AE3D))
    x = x ^ (x >> jnp.uint32(16))
    x = x * jnp.uint32(0x21F0AAAD)
    x = x ^ (x >> jnp.uint32(15))
    x = x * jnp.uint32(0x735A2D97)
    x = x ^ (x >> jnp.uint32(15))
    return x


def classifier_kernel(seed_ref, x_ref, w1_ref, b1_ref, w2_ref, b2_ref, o_ref,
                      *, training: bool, keep_thresh: int, keep_scale: float,
                      tile_m: int, ew_dtype):
    """One batch tile: fc1 -> leaky_relu -> dropout -> fc2.

    bf16 MXU operands, f32 accumulation + bias add; elementwise in ew_dtype.
    """
    # fc1: x (TM, Din) bf16 @ w1 (Din, Hp) bf16 -> f32, bias add in f32.
    h = jnp.dot(x_ref[...], w1_ref[...],
                preferred_element_type=jnp.float32) + b1_ref[...]

    # leaky_relu (and dropout) in ew_dtype (bf16 on v6e/v7x, f32 on v5e).
    h = h.astype(ew_dtype)
    h = jnp.where(h > 0, h, jnp.asarray(NEG_SLOPE, ew_dtype) * h)

    if training:
        # Global-coordinate hash -> mask is independent of TM / padding.
        row_off = (pl.program_id(0) * tile_m).astype(jnp.uint32)
        seed = seed_ref[0].astype(jnp.uint32)
        bits = _dropout_bits(h.shape, row_off, seed)
        # keep with prob (1-p): bits >= p * 2^32 ; keep-scale fused in select.
        h = jnp.where(bits >= jnp.uint32(keep_thresh),
                      h * jnp.asarray(keep_scale, ew_dtype),
                      jnp.asarray(0, ew_dtype))
        # TODO(synk): torch RNG stream is not reproduced, only dropout semantics.

    # fc2: h (TM, Hp) bf16 @ w2 (Hp, Cp) bf16 -> f32, bias add, store.
    o = jnp.dot(h.astype(w2_ref.dtype), w2_ref[...],
                preferred_element_type=jnp.float32) + b2_ref[...]
    o_ref[...] = o.astype(o_ref.dtype)


def prepare_params(w1, b1, w2, b2, *, param_dtype=jnp.bfloat16):
    """One-time parameter prep (do this at init, NOT per forward call).

    Pads hidden (H) and classes (C) to lane multiples of 128, casts weights to
    bf16 for the MXU, keeps biases in f32 pre-reshaped to (1, N).
    Zero-padding is exact: padded hidden lanes get bias 0 and zero w2 rows.
    """
    din, h = w1.shape
    c = w2.shape[1]
    hp = _round_up(h, LANE)
    cp = _round_up(c, LANE)
    w1p = jnp.pad(w1, ((0, 0), (0, hp - h))).astype(param_dtype)
    b1p = jnp.pad(b1, (0, hp - h)).reshape(1, hp).astype(jnp.float32)
    w2p = jnp.pad(w2, ((0, hp - h), (0, cp - c))).astype(param_dtype)
    b2p = jnp.pad(b2, (0, cp - c)).reshape(1, cp).astype(jnp.float32)
    return {"w1": w1p, "b1": b1p, "w2": w2p, "b2": b2p,
            "num_classes": c, "input_size": din}


def classifier_forward(x, params, *, training=False, p=0.5, seed=0,
                       tile_m=512, out_dtype=jnp.bfloat16,
                       elementwise_dtype=jnp.bfloat16,
                       act_dtype=jnp.bfloat16):
    """Fused classifier forward. `params` comes from prepare_params()."""
    assert 0.0 <= p < 1.0, "dropout p must be in [0, 1)"
    w1, b1, w2, b2 = params["w1"], params["b1"], params["w2"], params["b2"]
    C = params["num_classes"]
    B, Din = x.shape
    assert Din == params["input_size"]
    Hp = w1.shape[1]
    Cp = w2.shape[1]

    # Stream activations in bf16 (ideally produced upstream in bf16 already).
    if x.dtype != act_dtype:
        x = x.astype(act_dtype)

    # Batch tile: multiple of 8 sublanes, capped at tile_m; also cap at ~B/2 so
    # large batches give >=2 grid tiles (v7x megacore sharding).
    TM = min(tile_m, max(SUBLANE, _round_up((B + 1) // 2, SUBLANE)))
    B_pad = _round_up(B, TM)
    if B_pad != B:
        x = jnp.pad(x, ((0, B_pad - B), (0, 0)))

    # Dropout threshold: keep if bits >= p * 2^32 (clamped so p->1 can't wrap).
    do_dropout = bool(training) and p > 0.0
    keep_thresh = min(int(round(p * (2 ** 32))), 2 ** 32 - 1) if do_dropout else 0
    keep_scale = 1.0 / (1.0 - p) if do_dropout else 1.0

    # VMEM budget: resident weights + double-buffered x/out tiles + intermediate.
    est_bytes = (2 * (w1.size * w1.dtype.itemsize + w2.size * w2.dtype.itemsize
                      + b1.size * 4 + b2.size * 4)
                 + 2 * TM * Din * x.dtype.itemsize
                 + 2 * TM * Cp * jnp.dtype(out_dtype).itemsize
                 + TM * Hp * jnp.dtype(elementwise_dtype).itemsize)
    vmem_limit = None
    if est_bytes > 32 * 2 ** 20:
        vmem_limit = min(int(est_bytes * 1.25), 100 * 2 ** 20)
    # TODO(synk): for very large Din/Hp (weights alone near v7x's 64 MiB VMEM),
    # add a K grid axis over Din with an f32 accumulator scratch instead of
    # keeping both weight matrices fully resident.

    kernel = functools.partial(
        classifier_kernel, training=do_dropout, keep_thresh=keep_thresh,
        keep_scale=keep_scale, tile_m=TM, ew_dtype=elementwise_dtype)
    seed_arr = jnp.array([seed], dtype=jnp.int32)

    out = pl.pallas_call(
        kernel,
        out_shape=jax.ShapeDtypeStruct((B_pad, Cp), out_dtype),
        grid_spec=pltpu.PrefetchScalarGridSpec(
            num_scalar_prefetch=1,                      # seed -> SMEM
            grid=(B_pad // TM,),                        # batch tiles
            in_specs=[
                pl.BlockSpec((TM, Din), lambda i, s: (i, 0)),   # x tile (bf16)
                pl.BlockSpec((Din, Hp), lambda i, s: (0, 0)),   # w1 resident (bf16)
                pl.BlockSpec((1, Hp), lambda i, s: (0, 0)),     # b1 resident (f32)
                pl.BlockSpec((Hp, Cp), lambda i, s: (0, 0)),    # w2 resident (bf16)
                pl.BlockSpec((1, Cp), lambda i, s: (0, 0)),     # b2 resident (f32)
            ],
            out_specs=pl.BlockSpec((TM, Cp), lambda i, s: (i, 0)),
        ),
        compiler_params=pltpu.CompilerParams(
            dimension_semantics=("parallel",),          # megacore batch sharding
            vmem_limit_bytes=vmem_limit),
    )(seed_arr, x, w1, b1, w2, b2)

    return out[:B, :C]


def _init_linear(key, fan_in, fan_out):
    """Deterministic nn.Linear-style init: U(-1/sqrt(fan_in), 1/sqrt(fan_in))."""
    kw, kb = jax.random.split(key)
    bound = 1.0 / jnp.sqrt(fan_in)
    w = jax.random.uniform(kw, (fan_in, fan_out), jnp.float32, -bound, bound)
    b = jax.random.uniform(kb, (fan_out,), jnp.float32, -bound, bound)
    return w, b


if __name__ == "__main__":
    batch, input_size, hidden_size, num_classes = 8, 32, 32, 8

    key = jax.random.PRNGKey(0)
    kx, k1, k2 = jax.random.split(key, 3)

    x = jax.random.normal(kx, (batch, input_size), jnp.float32)
    w1, b1 = _init_linear(k1, input_size, hidden_size)
    w2, b2 = _init_linear(k2, hidden_size, num_classes)

    # One-time parameter prep (pad + bf16 cast happen here, not per call).
    params = prepare_params(w1, b1, w2, b2)

    # Eval mode: dropout is identity (matches model.eval()).
    out = classifier_forward(x, params, training=False)
    out = jax.block_until_ready(out)

    # Pure-JAX f32 reference against bf16-rounded activations
    # (kernel uses bf16 MXU operands and a bf16 output store -> loose tolerance).
    x_r = x.astype(jnp.bfloat16).astype(jnp.float32)
    h_ref = x_r @ w1 + b1
    h_ref = jnp.where(h_ref > 0, h_ref, NEG_SLOPE * h_ref)
    ref = h_ref @ w2 + b2

    assert out.shape == (batch, num_classes)
    assert jnp.allclose(out.astype(jnp.float32), ref, atol=5e-2, rtol=5e-2)

    # Exercise the training (dropout) path once; sanity-check it runs & is finite.
    out_tr = classifier_forward(x, params, training=True, p=0.5, seed=7)
    out_tr = jax.block_until_ready(out_tr)
    assert out_tr.shape == (batch, num_classes)
    assert bool(jnp.all(jnp.isfinite(out_tr.astype(jnp.float32))))

    print("KERNEL_OK")
</pallas_src>

<mosaic_0001>
module attributes {stable_mosaic.version = 11 : i64} {
  func.func @classifier_kernel(%arg0: i32, %arg1: memref<1xi32, #tpu.memory_space<smem>>, %arg2: memref<8x32xbf16, #tpu.memory_space<vmem>>, %arg3: memref<32x128xbf16, #tpu.memory_space<vmem>>, %arg4: memref<1x128xf32, #tpu.memory_space<vmem>>, %arg5: memref<128x128xbf16, #tpu.memory_space<vmem>>, %arg6: memref<1x128xf32, #tpu.memory_space<vmem>>, %arg7: memref<8x128xbf16, #tpu.memory_space<vmem>>) attributes {dimension_semantics = [#tpu.dimension_semantics<parallel>], iteration_bounds = array<i64: 1>, scalar_prefetch = 1 : i64, scratch_operands = 0 : i64, tpu.core_type = #tpu.core_type<tc>, window_params = [{transform_indices = @transform_0, window_bounds = array<i64: 8, 32>}, {pipeline_mode = #tpu.pipeline_mode<synchronous>, transform_indices = @transform_1, window_bounds = array<i64: 32, 128>}, {pipeline_mode = #tpu.pipeline_mode<synchronous>, transform_indices = @transform_2, window_bounds = array<i64: 1, 128>}, {pipeline_mode = #tpu.pipeline_mode<synchronous>, transform_indices = @transform_3, window_bounds = array<i64: 128, 128>}, {pipeline_mode = #tpu.pipeline_mode<synchronous>, transform_indices = @transform_4, window_bounds = array<i64: 1, 128>}, {transform_indices = @transform_5, window_bounds = array<i64: 8, 128>}]} {
    %c0 = arith.constant 0 : index
    %c0_0 = arith.constant 0 : index
    %0 = vector.load %arg2[%c0, %c0_0] : memref<8x32xbf16, #tpu.memory_space<vmem>>, vector<8x32xbf16>
    %c0_1 = arith.constant 0 : index
    %c0_2 = arith.constant 0 : index
    %1 = vector.load %arg3[%c0_1, %c0_2] : memref<32x128xbf16, #tpu.memory_space<vmem>>, vector<32x128xbf16>
    %cst = arith.constant dense<0.000000e+00> : vector<8x128xf32>
    %2 = tpu.matmul %0, %1, %cst {dimension_numbers = #tpu.dot_dimension_numbers<[1], [0], [0], [1], [0, 0, 1, 1], [], []>} : vector<8x32xbf16>, vector<32x128xbf16>, vector<8x128xf32> -> vector<8x128xf32>
    %c0_3 = arith.constant 0 : index
    %c0_4 = arith.constant 0 : index
    %3 = vector.load %arg4[%c0_3, %c0_4] : memref<1x128xf32, #tpu.memory_space<vmem>>, vector<1x128xf32>
    %4 = vector.broadcast %3 : vector<1x128xf32> to vector<8x128xf32>
    %5 = arith.addf %2, %4 : vector<8x128xf32>
    %6 = arith.truncf %5 : vector<8x128xf32> to vector<8x128xbf16>
    %cst_5 = arith.constant 0.000000e+00 : bf16
    %7 = vector.broadcast %cst_5 : bf16 to vector<8x128xbf16>
    %8 = arith.cmpf ogt, %6, %7 : vector<8x128xbf16>
    %cst_6 = arith.constant 1.000980e-02 : bf16
    %9 = vector.broadcast %cst_6 : bf16 to vector<8x128xbf16>
    %10 = arith.mulf %9, %6 : vector<8x128xbf16>
    %11 = arith.select %8, %6, %10 : vector<8x128xi1>, vector<8x128xbf16>
    %c0_7 = arith.constant 0 : index
    %c0_8 = arith.constant 0 : index
    %12 = vector.load %arg5[%c0_7, %c0_8] : memref<128x128xbf16, #tpu.memory_space<vmem>>, vector<128x128xbf16>
    %cst_9 = arith.constant dense<0.000000e+00> : vector<8x128xf32>
    %13 = tpu.matmul %11, %12, %cst_9 {dimension_numbers = #tpu.dot_dimension_numbers<[1], [0], [0], [1], [0, 0, 1, 1], [], []>} : vector<8x128xbf16>, vector<128x128xbf16>, vector<8x128xf32> -> vector<8x128xf32>
    %c0_10 = arith.constant 0 : index
    %c0_11 = arith.constant 0 : index
    %14 = vector.load %arg6[%c0_10, %c0_11] : memref<1x128xf32, #tpu.memory_space<vmem>>, vector<1x128xf32>
    %15 = vector.broadcast %14 : vector<1x128xf32> to vector<8x128xf32>
    %16 = arith.addf %13, %15 : vector<8x128xf32>
    %17 = arith.truncf %16 : vector<8x128xf32> to vector<8x128xbf16>
    %c0_12 = arith.constant 0 : index
    %c0_13 = arith.constant 0 : index
    %18 = vector.load %arg7[%c0_12, %c0_13] : memref<8x128xbf16, #tpu.memory_space<vmem>>, vector<8x128xbf16>
    tpu.vector_store %arg7[%c0_12, %c0_13], %17 {strides = array<i32>} : memref<8x128xbf16, #tpu.memory_space<vmem>>, vector<8x128xbf16>,
    return
  }
  func.func @transform_0(%arg0: i32, %arg1: memref<1xi32, #tpu.memory_space<smem>>) -> (i32, i32) {
    %c0_i32 = arith.constant 0 : i32
    %c0_i32_0 = arith.constant 0 : i32
    return %arg0, %c0_i32 : i32, i32
  }
  func.func @transform_1(%arg0: i32, %arg1: memref<1xi32, #tpu.memory_space<smem>>) -> (i32, i32) {
    %c0_i32 = arith.constant 0 : i32
    %c0_i32_0 = arith.constant 0 : i32
    %c0_i32_1 = arith.constant 0 : i32
    return %c0_i32, %c0_i32_0 : i32, i32
  }
  func.func @transform_2(%arg0: i32, %arg1: memref<1xi32, #tpu.memory_space<smem>>) -> (i32, i32) {
    %c0_i32 = arith.constant 0 : i32
    %c0_i32_0 = arith.constant 0 : i32
    %c0_i32_1 = arith.constant 0 : i32
    return %c0_i32, %c0_i32_0 : i32, i32
  }
  func.func @transform_3(%arg0: i32, %arg1: memref<1xi32, #tpu.memory_space<smem>>) -> (i32, i32) {
    %c0_i32 = arith.constant 0 : i32
    %c0_i32_0 = arith.constant 0 : i32
    %c0_i32_1 = arith.constant 0 : i32
    return %c0_i32, %c0_i32_0 : i32, i32
  }
  func.func @transform_4(%arg0: i32, %arg1: memref<1xi32, #tpu.memory_space<smem>>) -> (i32, i32) {
    %c0_i32 = arith.constant 0 : i32
    %c0_i32_0 = arith.constant 0 : i32
    %c0_i32_1 = arith.constant 0 : i32
    return %c0_i32, %c0_i32_0 : i32, i32
  }
  func.func @transform_5(%arg0: i32, %arg1: memref<1xi32, #tpu.memory_space<smem>>) -> (i32, i32) {
    %c0_i32 = arith.constant 0 : i32
    %c0_i32_0 = arith.constant 0 : i32
    return %arg0, %c0_i32 : i32, i32
  }
}

</mosaic_0001>

<bundles_post_ra>
// kernel: tpu_custom_call.1
= control target key start
LH: loop header
LB: loop body
LE: loop exit
PB: predicated region body
PF: predicated region fallthrough
CT: control target
= control target key end

     0   :  { %12 = vsyncpa [#allocation5], 0  ;;  %s435_s0 = inlined_call_operand.<no memory space> [shape: s32[1], index: 0, kind: input, shape index: {}]   ;;  %s436_s1 = inlined_call_operand.hbm [shape: bf16[8,32], index: 1, kind: input, shape index: {}]   ;;  %s437_s2 = inlined_call_operand.hbm [shape: bf16[32,128], index: 2, kind: input, shape index: {}]   ;;  %s438_s3 = inlined_call_operand.vmem [shape: f32[1,128], index: 3, kind: input, shape index: {}]   ;;  %s439_s4 = inlined_call_operand.hbm [shape: bf16[128,128], index: 4, kind: input, shape index: {}]   ;;  %s440_s5 = inlined_call_operand.vmem [shape: f32[1,128], index: 5, kind: input, shape index: {}]   ;;  %s441_s6 = inlined_call_operand.hbm [shape: bf16[8,128], index: 6, kind: output, shape index: {}]  }
   0x1   :  { %13 = vsyncpa [#allocation8], 0  ;;  %s30_s22 = sshll.u32 %s437_s2, 4  ;;  %s31_s22 = int_to_ptr.hbm [resolvable:$true] %s30_s22 }
   0x2   :  { %14 = vsyncpa [#allocation6], 0  ;;  %s376_s23 = smov [#allocation7]   ;;  %s20_s27 = sshll.u32 %s436_s1, 4  ;;  %s21_s27 = int_to_ptr.hbm [resolvable:$true] %s20_s27 }
   0x3   :  { %s32_s24 = sshll.u32 %s376_s23, 4  ;;  %s377_s28 = smov 64   ;;  %s33_s24 = int_to_ptr.vmem [resolvable:$true] %s32_s24 }
   0x4   :  { %s378_s29 = smov 4   ;;  %s379_s30 = smov [#allocation4]  }
   0x5   :  { %38 = dma.hbm_to_vmem [thread:$0]  %s31_s22, 256, %s33_s24, [#allocation8], %s377_s28, %s377_s28, %s378_s29  }
   0x6   :  { %s22_s7 = sshll.u32 %s379_s30, 4  ;;  %s45_s10 = sshll.u32 %s439_s4, 4  ;;  %s23_s7 = int_to_ptr.vmem [resolvable:$true] %s22_s7  ;;  %s46_s10 = int_to_ptr.hbm [resolvable:$true] %s45_s10 }
   0x7   :  { %25 = dma.hbm_to_vmem [thread:$0]  %s21_s27, 64, %s23_s7, [#allocation5]  }
   0x8   :  { %s380_s2 = smov [#allocation9]  }
   0x9   :  { %s47_s11 = sshll.u32 %s380_s2, 4  ;;  %s48_s11 = int_to_ptr.vmem [resolvable:$true] %s47_s11 }
   0xa   :  { %53 = dma.hbm_to_vmem [thread:$0]  %s46_s10, 1024, %s48_s11, [#allocation8], %s377_s28, %s377_s28, %s378_s29  }
   0xb   :  { %370 = dma.done.wait [#allocation5], 64  }
   0xc   :  { %371 = vsyncadd [#allocation5], 4294967232 }
   0xd   :  { %372 = dma.done.wait [#allocation8], 1280  }
   0xe   :  { %373 = vsyncadd [#allocation8], 4294966016  ;;  %v257_v0 = vld [vmem:[#allocation7 + $0x8] sm:$0xff]  ;;  %v256_v2 = vld [vmem:[#allocation7] sm:$0xff]  ;;  %vm90_vm0 = vcmask 261120   ;;  %s381_s14 = smov [#allocation10]  }
   0xf   :  { %v265_v1 = vld [vmem:[#allocation9 + $0x38] sm:$0xff]  ;;  %100 = vmatpush.bf16.msra.mxu0 %v257_v0  ;;  %v264_v3 = vld [vmem:[#allocation9 + $0x30] sm:$0xff]  ;;  %v69_v4 = vld [vmem:[#allocation4] sm:$0xf]  ;;  %s202_s15 = sshll.u32 %s381_s14, 4  ;;  %s204_s17 = sshll.u32 %s441_s6, 4  ;;  %s203_s15 = int_to_ptr.vmem [resolvable:$true] %s202_s15  ;;  %s205_s17 = int_to_ptr.hbm [resolvable:$true] %s204_s17 }
  0x10   :  { %182 = vmatpush.bf16.msra.mxu1 %v265_v1  ;;  %v263_v5 = vld [vmem:[#allocation9 + $0x28] sm:$0xff]  ;;  %v262_v6 = vld [vmem:[#allocation9 + $0x20] sm:$0xff]  ;;  %v261_v7 = vld [vmem:[#allocation9 + $0x18] sm:$0xff] }
  0x11   :  { %v260_v8 = vld [vmem:[#allocation9 + $0x10] sm:$0xff]  ;;  %v259_v9 = vld [vmem:[#allocation9 + $0x8] sm:$0xff]  ;;  %v258_v10 = vld [vmem:[#allocation9] sm:$0xff] }
  0x12   :  { %v272_v11 = vld [vmem:[%s438_s3] ss:$0 sm:$0xff] }
  0x13   :  { %101 = vmatpush.bf16.msra.mxu0 %v256_v2  ;;  %v273_v20 = vld [vmem:[%s440_s5] ss:$0 sm:$0xff] }
  0x14   :  { %183 = vmatpush.bf16.msra.mxu1 %v264_v3 }
  0x16   :  { %223 = vmatmul.msk.bf16.vlgmr.msra.gmra.mxu0 %vm90_vm0, %v69_v4 }
  0x18   :  { %184 = vmatpush.bf16.msra.mxu1 %v263_v5 }
  0x1c   :  { %185 = vmatpush.bf16.msra.mxu1 %v262_v6 }
  0x20   :  { %186 = vmatpush.bf16.msra.mxu1 %v261_v7 }
  0x24   :  { %187 = vmatpush.bf16.msra.mxu1 %v260_v8 }
  0x28   :  { %188 = vmatpush.bf16.msra.mxu1 %v259_v9 }
  0x2c   :  { %189 = vmatpush.bf16.msra.mxu1 %v258_v10 }
  0x93   :  { %v103_v12 = vpop.f32.mrf.mxu0 }
  0x94   :  { %v104_v13 = vadd.f32 %v272_v11, %v103_v12 }
  0x96   :  { %v107_v14 = vpack.c.bf16 %v104_v13, %v104_v13 }
  0x98   :  { %v108_v15 = vunpack.c.l.bf16 %v107_v14 }
  0x9a   :  { %v110_v16 = vmul.f32 0.010009766, %v108_v15  ;;  %vm109_vm1 = vcmp.gt.f32.partialorder %v108_v15, 0.0 }
  0x9b   :  { %v105_v17 = vpop.f32.mrf.mxu0  ;;  %vm112_vm2 = vmpackc.low %vm109_vm1, %vm109_vm1 }
  0x9c   :  { %v111_v18 = vpack.c.bf16 %v110_v16, %v110_v16 }
  0x9e   :  { %v113_v19 = vsel %vm112_vm2, %v107_v14, %v111_v18 }
  0x9f   :  { %190 = vmatmul.bf16.vlgmr.msra.gmra.mxu1 %v113_v19 }
 0x11c   :  { %v191_v21 = vpop.f32.mrf.mxu1 }
 0x11d   :  { %v192_v22 = vadd.f32 %v273_v20, %v191_v21 }
 0x11f   :  { %v195_v23 = vpack.c.bf16 %v192_v22, %v192_v22 }
 0x121   :  { %196 = vst [vmem:[#allocation10] sm:$0xf] %v195_v23 }
 0x122   :  { %207 = dma.vmem_to_hbm [thread:$0]  %s203_s15, 64, %s205_s17, [#allocation6]  }
 0x124   :  { %v193_v24 = vpop.f32.mrf.mxu1 }
 0x125   :  { %374 = dma.done.wait [#allocation6], 64  }
 0x126   :  { %375 = vsyncadd [#allocation6], 4294967232 }
 0x127   :  { %212 = vsyncpa [#allocation5], 1 }
 0x128   :  { %213 = vsyncpa [#allocation8], 1 }
 0x129   :  { %214 = vsyncpa [#allocation6], 1 }

</bundles_post_ra>
